<compile_context>
chip_gen: v7x
topology: tpu7x:2x2x1
jax: 0.10.0
libtpu: 0.0.40
codegen_flags: <defaults>
</compile_context>

<pallas_src>
import functools

import jax
import jax.numpy as jnp
from jax.experimental import pallas as pl
from jax.experimental.pallas import tpu as pltpu


def _adain_kernel(x_ref, sb_ref, o_ref, *, eps, inv_n, inv_nm1):
    """One (tr, HW) row-block: per-row mean/var + style scale/shift.

    Output is written as `a * x + b` with a = ys * rsqrt(var + eps) and
    b = yb - a * mu, so the centered value (x - mu) only feeds the variance
    reduction and is never carried across it to the store (saves a block-sized
    f32 temp + one full-width store per element; matters most on v5e's single
    vst slot and v7x's 64 MiB VMEM).
    """
    x = x_ref[...].astype(jnp.float32)                        # (TR, HW)
    mu = jnp.sum(x, axis=-1, keepdims=True) * inv_n           # (TR, 1) XLU reduce
    d = x - mu                                                # consumed only by the reduce
    var = jnp.sum(d * d, axis=-1, keepdims=True) * inv_nm1    # unbiased (ddof=1)
    inv_std = jax.lax.rsqrt(var + eps)                        # EUP slot (free-ish)

    sb = sb_ref[...].astype(jnp.float32)                      # (TR, 2): [scale, bias]
    a = sb[:, 0:1] * inv_std                                  # (TR, 1)
    b = sb[:, 1:2] - a * mu                                   # (TR, 1)
    o_ref[...] = (a * x + b).astype(o_ref.dtype)


def adain(x, y, eps=1e-8, *, target_block_bytes=8 << 20):
    """Pallas AdaIN.

    x: (B, C, H, W) content features.
    y: (B, 2*C) style vector; first C channels are scale, last C are bias.
    Returns ys * (x - mean_{H,W}(x)) / sqrt(var_{H,W}(x, unbiased) + eps) + yb.
    """
    B, C, H, W = x.shape
    assert y.shape == (B, 2 * C), (y.shape, (B, 2 * C))
    R = B * C
    HW = H * W

    # Lane-dense (rows, HW) content slab (metadata-only reshape) and one merged
    # (R, 2) style-parameter slab: lane 0 = scale, lane 1 = bias.
    x2d = x.reshape(R, HW)
    sb = y.reshape(B, 2, C).transpose(0, 2, 1).reshape(R, 2)
    # TODO(synk): for lane-sparse spatial maps (HW < 128 or HW % 128 != 0,
    # e.g. 7x7 / 14x14) pack several (B,C) rows per 128-lane row to avoid
    # masked partial stores; current layout is still correct for those sizes.

    # ---- block sizing -------------------------------------------------------
    # Rows per block: multiple of 8 (sublane-aligned), targeting ~8 MiB blocks
    # so the ~0.35 us per-grid-step overhead stays <10% of DMA time even at
    # v7x's 3.2 TB/s HBM, capped by a VMEM accounting budget that fits v7x's
    # 64 MiB VMEM (double-buffered in+out blocks + ~2 f32-block temporaries).
    itemsize = jnp.dtype(x.dtype).itemsize
    row_bytes = HW * itemsize
    vmem_budget = 36 * 1024 * 1024
    per_row_vmem = 4 * row_bytes + 2 * HW * 4
    tr = max(8, (target_block_bytes // row_bytes) // 8 * 8)
    tr = min(tr, max(8, (vmem_budget // per_row_vmem) // 8 * 8))
    # TODO(synk): for very large HW (e.g. 512x512 f32) even an 8-row block can
    # overflow v7x's scoped VMEM; that case needs a two-level reduction over an
    # extra "arbitrary" HW grid axis with running sum/sumsq scratch.

    # No padding of the row axis: cap tr, use grid = cdiv(R, tr); the ragged
    # last block is masked by Pallas (OOB reads are row-local garbage, OOB
    # writes are dropped), so no extra HBM passes.
    r_ceil8 = -(-R // 8) * 8
    tr = min(tr, r_ceil8)
    if tr >= R:
        tr = R  # single full-extent block is always a legal block shape
    grid = (pl.cdiv(R, tr),)

    n = float(HW)
    inv_n = 1.0 / n
    inv_nm1 = 1.0 / max(n - 1.0, 1.0)  # guard HW == 1 (torch would give NaN)

    out2d = pl.pallas_call(
        functools.partial(
            _adain_kernel, eps=float(eps), inv_n=inv_n, inv_nm1=inv_nm1
        ),
        out_shape=jax.ShapeDtypeStruct((R, HW), x.dtype),
        grid_spec=pltpu.PrefetchScalarGridSpec(
            num_scalar_prefetch=0,
            grid=grid,
            in_specs=[
                pl.BlockSpec((tr, HW), lambda i: (i, 0)),
                pl.BlockSpec((tr, 2), lambda i: (i, 0)),
            ],
            out_specs=pl.BlockSpec((tr, HW), lambda i: (i, 0)),
        ),
        compiler_params=pltpu.CompilerParams(
            # "parallel" lets the runtime shard row blocks across v7x's 2 TCs.
            # TODO(synk): if a v7x profile shows a single TC in use, switch this
            # axis to pltpu.CORE_PARALLEL (kept "parallel" to stay safe on
            # 1-TC v5e/v6e).
            dimension_semantics=("parallel",),
            vmem_limit_bytes=48 * 1024 * 1024,
        ),
    )(x2d, sb)

    return out2d.reshape(B, C, H, W)


if __name__ == "__main__":
    key = jax.random.PRNGKey(0)
    kx, ky = jax.random.split(key)

    B, C, H, W = 2, 4, 16, 16
    x = jax.random.normal(kx, (B, C, H, W), dtype=jnp.float32)
    y = jax.random.normal(ky, (B, 2 * C), dtype=jnp.float32)
    eps = 1e-8

    out = adain(x, y, eps)
    out = jax.block_until_ready(out)

    # Pure-JAX reference matching torch semantics (unbiased variance, ddof=1).
    mu = jnp.mean(x, axis=(2, 3), keepdims=True)
    var = jnp.var(x, axis=(2, 3), keepdims=True, ddof=1) + eps
    ys_ref = y[:, :C].reshape(B, C, 1, 1)
    yb_ref = y[:, C:].reshape(B, C, 1, 1)
    ref = ys_ref * (x - mu) / jnp.sqrt(var) + yb_ref

    assert out.shape == ref.shape, (out.shape, ref.shape)
    assert out.dtype == x.dtype, out.dtype
    max_err = float(jnp.max(jnp.abs(out - ref)))
    assert bool(jnp.allclose(out, ref, rtol=1e-5, atol=1e-5)), max_err

    print("KERNEL_OK")
</pallas_src>

<mosaic_0001>
module attributes {stable_mosaic.version = 11 : i64} {
  func.func @_adain_kernel(%arg0: i32, %arg1: memref<8x256xf32, #tpu.memory_space<vmem>>, %arg2: memref<8x2xf32, #tpu.memory_space<vmem>>, %arg3: memref<8x256xf32, #tpu.memory_space<vmem>>) attributes {dimension_semantics = [#tpu.dimension_semantics<parallel>], iteration_bounds = array<i64: 1>, scalar_prefetch = 0 : i64, scratch_operands = 0 : i64, tpu.core_type = #tpu.core_type<tc>, window_params = [{transform_indices = @transform_0, window_bounds = array<i64: 8, 256>}, {transform_indices = @transform_1, window_bounds = array<i64: 8, 2>}, {transform_indices = @transform_2, window_bounds = array<i64: 8, 256>}]} {
    %c0 = arith.constant 0 : index
    %c0_0 = arith.constant 0 : index
    %0 = vector.load %arg1[%c0, %c0_0] : memref<8x256xf32, #tpu.memory_space<vmem>>, vector<8x256xf32>
    %cst = arith.constant dense<0.000000e+00> : vector<8xf32>
    %1 = vector.multi_reduction <add>, %0, %cst [1] : vector<8x256xf32> to vector<8xf32>
    %2 = vector.shape_cast %1 : vector<8xf32> to vector<8x1xf32>
    %cst_1 = arith.constant 3.906250e-03 : f32
    %3 = vector.broadcast %cst_1 : f32 to vector<8x1xf32>
    %4 = arith.mulf %2, %3 : vector<8x1xf32>
    %5 = vector.broadcast %4 : vector<8x1xf32> to vector<8x256xf32>
    %6 = arith.subf %0, %5 : vector<8x256xf32>
    %7 = arith.mulf %6, %6 : vector<8x256xf32>
    %cst_2 = arith.constant dense<0.000000e+00> : vector<8xf32>
    %8 = vector.multi_reduction <add>, %7, %cst_2 [1] : vector<8x256xf32> to vector<8xf32>
    %9 = vector.shape_cast %8 : vector<8xf32> to vector<8x1xf32>
    %cst_3 = arith.constant 0.00392156886 : f32
    %10 = vector.broadcast %cst_3 : f32 to vector<8x1xf32>
    %11 = arith.mulf %9, %10 : vector<8x1xf32>
    %cst_4 = arith.constant 9.99999993E-9 : f32
    %12 = vector.broadcast %cst_4 : f32 to vector<8x1xf32>
    %13 = arith.addf %11, %12 : vector<8x1xf32>
    %14 = math.rsqrt %13 : vector<8x1xf32>
    %c0_5 = arith.constant 0 : index
    %c0_6 = arith.constant 0 : index
    %15 = vector.load %arg2[%c0_5, %c0_6] : memref<8x2xf32, #tpu.memory_space<vmem>>, vector<8x2xf32>
    %16 = vector.extract_strided_slice %15 {offsets = [0, 0], sizes = [8, 1], strides = [1, 1]} : vector<8x2xf32> to vector<8x1xf32>
    %17 = arith.mulf %16, %14 : vector<8x1xf32>
    %18 = vector.extract_strided_slice %15 {offsets = [0, 1], sizes = [8, 1], strides = [1, 1]} : vector<8x2xf32> to vector<8x1xf32>
    %19 = arith.mulf %17, %4 : vector<8x1xf32>
    %20 = arith.subf %18, %19 : vector<8x1xf32>
    %21 = vector.broadcast %17 : vector<8x1xf32> to vector<8x256xf32>
    %22 = arith.mulf %21, %0 : vector<8x256xf32>
    %23 = vector.broadcast %20 : vector<8x1xf32> to vector<8x256xf32>
    %24 = arith.addf %22, %23 : vector<8x256xf32>
    %c0_7 = arith.constant 0 : index
    %c0_8 = arith.constant 0 : index
    %25 = vector.load %arg3[%c0_7, %c0_8] : memref<8x256xf32, #tpu.memory_space<vmem>>, vector<8x256xf32>
    tpu.vector_store %arg3[%c0_7, %c0_8], %24 {strides = array<i32>} : memref<8x256xf32, #tpu.memory_space<vmem>>, vector<8x256xf32>,
    return
  }
  func.func @transform_0(%arg0: i32) -> (i32, i32) {
    %c0_i32 = arith.constant 0 : i32
    %c0_i32_0 = arith.constant 0 : i32
    return %arg0, %c0_i32 : i32, i32
  }
  func.func @transform_1(%arg0: i32) -> (i32, i32) {
    %c0_i32 = arith.constant 0 : i32
    %c0_i32_0 = arith.constant 0 : i32
    return %arg0, %c0_i32 : i32, i32
  }
  func.func @transform_2(%arg0: i32) -> (i32, i32) {
    %c0_i32 = arith.constant 0 : i32
    %c0_i32_0 = arith.constant 0 : i32
    return %arg0, %c0_i32 : i32, i32
  }
}

</mosaic_0001>

<bundles_post_ra>
// kernel: tpu_custom_call.1
= control target key start
LH: loop header
LB: loop body
LE: loop exit
PB: predicated region body
PF: predicated region fallthrough
CT: control target
= control target key end

     0   :  { %7 = vsyncpa [#allocation3], 0  ;;  %s183_s0 = inlined_call_operand.hbm [shape: f32[8,256], index: 0, kind: input, shape index: {}]   ;;  %s184_s1 = inlined_call_operand.vmem [shape: f32[8,2], index: 1, kind: input, shape index: {}]   ;;  %s185_s2 = inlined_call_operand.hbm [shape: f32[8,256], index: 2, kind: output, shape index: {}]  }
   0x1   :  { %8 = vsyncpa [#allocation4], 0  ;;  %s136_s9 = smov [#allocation2]   ;;  %s88_s13 = scalar_lea.hbm %s183_s0, 256 }
   0x2   :  { %s15_s10 = sshll.u32 %s136_s9, 4  ;;  %p89_p0 = scmp.ne.s32.totalorder %s183_s0, %s88_s13  ;;  %s16_s10 = int_to_ptr.vmem [resolvable:$true] %s15_s10 }
   0x3   :  { %p92_p1 = scmp.lt.u32.totalorder %s88_s13, %s183_s0 }
   0x5   :  { %p94_p2 = pnand %p92_p1, %p89_p0 }
   0x7   :  { %97 = shalt.err (!%p94_p2)
}
   0x8   :  { %s98_s18 = scalar_lea.vmem %s16_s10, 256  ;;  %p103_p4 = scmp.lt.s32.totalorder %s16_s10, %s16_s10 }
   0x9   :  { %p99_p3 = scmp.ne.s32.totalorder %s16_s10, %s98_s18  ;;  %p104_p5 = scmp.lt.s32.totalorder %s98_s18, %s98_s18 }
   0xb   :  { %p105_p6 = por %p104_p5, %p103_p4 }
   0xd   :  { %p106_p7 = pnand %p105_p6, %p99_p3 }
   0xf   :  { %109 = shalt.err (!%p106_p7)
}
  0x10   :  { %18 = dma.hbm_to_vmem [thread:$0]  %s183_s0, 256, %s16_s10, [#allocation3]  }
  0x11   :  { %132 = dma.done.wait [#allocation3], 256  }
  0x12   :  { %133 = vsyncadd [#allocation3], 4294967040  ;;  %v24_v0 = vld [vmem:[#allocation2] sm:$0xff]  ;;  %v25_v1 = vld [vmem:[#allocation2 + $0x8] sm:$0xff]  ;;  %v137_v10 = vmov 0   ;;  %v138_v14 = vmov 1  }
  0x13   :  { %v26_v2 = vadd.f32 %v25_v1, %v24_v0  ;;  %84 = vset.pattern.permute.xlu1 %v137_v10  ;;  %85 = vset.pattern.permute.xlu0 %v138_v14  ;;  %v40_v15 = vld [vmem:[%s184_s1] sm:$0xff]  ;;  %s139_s22 = smov 1   ;;  %s140_s23 = smov [#allocation5]  }
  0x14   :  { %s70_s24 = sshll.u32 %s140_s23, 4  ;;  %s71_s24 = int_to_ptr.vmem [resolvable:$true] %s70_s24 }
  0x15   :  { %27 = vadd.xlane.f32.xlu0 %v26_v2  ;;  %s110_s1 = scalar_lea.vmem %s71_s24, 256  ;;  %p115_p9 = scmp.lt.s32.totalorder %s71_s24, %s71_s24 }
  0x16   :  { %p111_p8 = scmp.ne.s32.totalorder %s71_s24, %s110_s1  ;;  %p116_p10 = scmp.lt.s32.totalorder %s110_s1, %s110_s1 }
  0x18   :  { %p117_p11 = por %p116_p10, %p115_p9 }
  0x1a   :  { %p118_p12 = pnand %p117_p11, %p111_p8 }
  0xa2   :  { %v28_v3 = vpop.xlane.xlu0 %27 }
  0xa3   :  { %v29_v4 = vmul.f32 0.00390625, %v28_v3 }
  0xa5   :  { %v30_v5 = vsub.f32 %v24_v0, %v29_v4  ;;  %v31_v6 = vsub.f32 %v25_v1, %v29_v4 }
  0xa7   :  { %v32_v7 = vmul.f32 %v30_v5, %v30_v5  ;;  %v33_v8 = vmul.f32 %v31_v6, %v31_v6 }
  0xa9   :  { %v34_v9 = vadd.f32 %v33_v8, %v32_v7 }
  0xab   :  { %35 = vadd.xlane.f32.xlu0 %v34_v9 }
 0x138   :  { %v36_v11 = vpop.xlane.xlu0 %35 }
 0x139   :  { %v37_v12 = vmul.f32 0.003921569, %v36_v11 }
 0x13b   :  { %v38_v13 = vadd.f32 1e-08, %v37_v12 }
 0x13d   :  { %86 = vrsqrt.f32 %v38_v13 }
 0x147   :  { %v87_v16 = vpop.eup %86 }
 0x148   :  { %v41_v17 = vmul.f32 %v87_v16, %v40_v15 }
 0x14a   :  { %v42_v18 = vmul.f32 %v41_v17, %v29_v4 }
 0x14c   :  { %44 = vrot.lane.b32.xlu1 %v42_v18, %s139_s22 }
 0x150   :  { %50 = vperm.xlu1 %84, %v41_v17  }
 0x1be   :  { %v45_v19 = vpop.permute.xlu1 %44 }
 0x1bf   :  { %v47_v20 = vsub.f32 %v40_v15, %v45_v19 }
 0x1c1   :  { %57 = vperm.xlu0 %85, %v47_v20  }
 0x1cf   :  { %v51_v21 = vpop.permute.xlu1 %50 }
 0x1d0   :  { %v53_v22 = vmul.f32 %v51_v21, %v24_v0  ;;  %v54_v23 = vmul.f32 %v51_v21, %v25_v1 }
 0x240   :  { %v58_v24 = vpop.permute.xlu0 %57 }
 0x241   :  { %v60_v25 = vadd.f32 %v58_v24, %v53_v22  ;;  %v61_v26 = vadd.f32 %v58_v24, %v54_v23 }
 0x243   :  { %62 = vst [vmem:[#allocation5] sm:$0xff] %v60_v25  ;;  %63 = vst [vmem:[#allocation5 + $0x8] sm:$0xff] %v61_v26 }
 0x244   :  { %121 = shalt.err (!%p118_p12)
}
 0x245   :  { %s122_s27 = scalar_lea.hbm %s185_s2, 256 }
 0x246   :  { %p123_p13 = scmp.ne.s32.totalorder %s185_s2, %s122_s27  ;;  %p126_p0 = scmp.lt.u32.totalorder %s122_s27, %s185_s2 }
 0x248   :  { %p128_p1 = pnand %p126_p0, %p123_p13 }
 0x24a   :  { %131 = shalt.err (!%p128_p1)
}
 0x24b   :  { %73 = dma.vmem_to_hbm [thread:$0]  %s71_s24, 256, %s185_s2, [#allocation4]  }
 0x24c   :  { %134 = dma.done.wait [#allocation4], 256  }
 0x24d   :  { %135 = vsyncadd [#allocation4], 4294967040 }
 0x24e   :  { %77 = vsyncpa [#allocation3], 1 }
 0x24f   :  { %78 = vsyncpa [#allocation4], 1 }

</bundles_post_ra>
